<compile_context>
chip_gen: v7x
topology: tpu7x:2x2x1
jax: 0.10.0
libtpu: 0.0.40
codegen_flags: <defaults>
</compile_context>

<pallas_src>
import jax
import jax.numpy as jnp
from jax.experimental import pallas as pl
from jax.experimental.pallas import tpu as pltpu


def _minmax_kernel(c1_ref, c2_ref, x_ref, y_ref, o_ref):
    # c1/c2 are SMEM scalars; x/y/o are lane-dense (block_rows, 128) VMEM tiles.
    c1 = c1_ref[0]
    c2 = c2_ref[0]
    x = x_ref[...]
    y = y_ref[...]
    # Keep the multiplies (do not fold 0 / -1) so NaN/Inf semantics match torch.
    o_ref[...] = jnp.maximum(y * c2, jnp.minimum(y * c1, x))


def my_model_forward(x, y, const1, const2):
    """x, y: (B, F) float32.  const1/const2: (1, F) float32, uniform across F
    (as in the module: [[0,0,0]] and [[-1,-1,-1]])."""
    assert x.shape == y.shape and x.dtype == y.dtype
    B, F = x.shape

    # Uniform per-feature constants -> a single scalar each, via SMEM.
    # TODO(synk): non-uniform per-feature constants would need a per-lane const
    # tile matched to the flattened layout instead of a scalar.
    c1 = const1.reshape(-1)[:1].astype(x.dtype)
    c2 = const2.reshape(-1)[:1].astype(x.dtype)

    LANES = 128
    total = B * F
    rows = -(-total // LANES)  # cdiv
    if rows <= 1024:
        # Small problem: one block, rows rounded up to the 8-sublane multiple.
        block_rows = max(8, -(-rows // 8) * 8)
    else:
        # Large problem: 1024x128 f32 = 512 KiB per operand; with 2 inputs +
        # 1 output double-buffered that is ~3 MiB, well inside v7x VMEM.
        block_rows = 1024
    rows_padded = -(-rows // block_rows) * block_rows
    padded = rows_padded * LANES

    def _to_lane_dense(a):
        flat = a.reshape(-1)
        flat = jnp.pad(flat, (0, padded - total))  # zero pad: no NaN from pad region
        return flat.reshape(rows_padded, LANES)

    xp = _to_lane_dense(x)
    yp = _to_lane_dense(y)

    grid = (rows_padded // block_rows,)
    data_spec = pl.BlockSpec((block_rows, LANES), lambda i: (i, 0))
    smem_spec = pl.BlockSpec(memory_space=pltpu.MemorySpace.SMEM)

    out = pl.pallas_call(
        _minmax_kernel,
        out_shape=jax.ShapeDtypeStruct((rows_padded, LANES), x.dtype),
        grid=grid,
        in_specs=[smem_spec, smem_spec, data_spec, data_spec],
        out_specs=data_spec,
        compiler_params=pltpu.CompilerParams(
            dimension_semantics=("parallel",),
            vmem_limit_bytes=32 * 1024 * 1024,
        ),
    )(c1, c2, xp, yp)

    return out.reshape(-1)[:total].reshape(B, F)


if __name__ == "__main__":
    # Module parameters (deterministic, from __init__).
    F = 3
    const1 = jnp.zeros((1, F), dtype=jnp.float32)   # [[0, 0, 0]]
    const2 = -jnp.ones((1, F), dtype=jnp.float32)   # [[-1, -1, -1]]

    def reference(x, y):
        return jnp.maximum(y * const2, jnp.minimum(y * const1, x))

    key = jax.random.PRNGKey(0)

    # 1) Small shape consistent with the module's [N, 3] inputs.
    B = 2
    kx, ky, key = *jax.random.split(key, 2), key
    x = jax.random.normal(kx, (B, F), dtype=jnp.float32)
    y = jax.random.normal(ky, (B, F), dtype=jnp.float32)
    out = jax.block_until_ready(my_model_forward(x, y, const1, const2))
    assert out.shape == (B, F)
    assert jnp.allclose(out, reference(x, y), atol=1e-6)

    # 2) Larger batch to exercise the multi-block pipelined grid path.
    B2 = 50_000
    kx2, ky2 = jax.random.split(jax.random.PRNGKey(1))
    x2 = jax.random.normal(kx2, (B2, F), dtype=jnp.float32)
    y2 = jax.random.normal(ky2, (B2, F), dtype=jnp.float32)
    out2 = jax.block_until_ready(my_model_forward(x2, y2, const1, const2))
    assert jnp.allclose(out2, reference(x2, y2), atol=1e-6)

    print("KERNEL_OK")
</pallas_src>

<mosaic_0001>
module attributes {stable_mosaic.version = 11 : i64} {
  func.func @_minmax_kernel(%arg0: i32, %arg1: memref<1xf32, #tpu.memory_space<smem>>, %arg2: memref<1xf32, #tpu.memory_space<smem>>, %arg3: memref<8x128xf32, #tpu.memory_space<vmem>>, %arg4: memref<8x128xf32, #tpu.memory_space<vmem>>, %arg5: memref<8x128xf32, #tpu.memory_space<vmem>>) attributes {dimension_semantics = [#tpu.dimension_semantics<parallel>], iteration_bounds = array<i64: 1>, scalar_prefetch = 0 : i64, scratch_operands = 0 : i64, tpu.core_type = #tpu.core_type<tc>, window_params = [{transform_indices = @transform_0, window_bounds = array<i64: 1>}, {transform_indices = @transform_1, window_bounds = array<i64: 1>}, {transform_indices = @transform_2, window_bounds = array<i64: 8, 128>}, {transform_indices = @transform_3, window_bounds = array<i64: 8, 128>}, {transform_indices = @transform_4, window_bounds = array<i64: 8, 128>}]} {
    %c0 = arith.constant 0 : index
    %0 = memref.load %arg1[%c0] : memref<1xf32, #tpu.memory_space<smem>>
    %c0_0 = arith.constant 0 : index
    %1 = memref.load %arg2[%c0_0] : memref<1xf32, #tpu.memory_space<smem>>
    %c0_1 = arith.constant 0 : index
    %c0_2 = arith.constant 0 : index
    %2 = vector.load %arg3[%c0_1, %c0_2] : memref<8x128xf32, #tpu.memory_space<vmem>>, vector<8x128xf32>
    %c0_3 = arith.constant 0 : index
    %c0_4 = arith.constant 0 : index
    %3 = vector.load %arg4[%c0_3, %c0_4] : memref<8x128xf32, #tpu.memory_space<vmem>>, vector<8x128xf32>
    %4 = vector.broadcast %1 : f32 to vector<8x128xf32>
    %5 = arith.mulf %3, %4 : vector<8x128xf32>
    %6 = vector.broadcast %0 : f32 to vector<8x128xf32>
    %7 = arith.mulf %3, %6 : vector<8x128xf32>
    %8 = arith.minimumf %7, %2 : vector<8x128xf32>
    %9 = arith.maximumf %5, %8 : vector<8x128xf32>
    %c0_5 = arith.constant 0 : index
    %c0_6 = arith.constant 0 : index
    %10 = vector.load %arg5[%c0_5, %c0_6] : memref<8x128xf32, #tpu.memory_space<vmem>>, vector<8x128xf32>
    tpu.vector_store %arg5[%c0_5, %c0_6], %9 {strides = array<i32>} : memref<8x128xf32, #tpu.memory_space<vmem>>, vector<8x128xf32>,
    return
  }
  func.func @transform_0(%arg0: i32) -> i32 {
    %c0_i32 = arith.constant 0 : i32
    %c0_i32_0 = arith.constant 0 : i32
    return %c0_i32 : i32
  }
  func.func @transform_1(%arg0: i32) -> i32 {
    %c0_i32 = arith.constant 0 : i32
    %c0_i32_0 = arith.constant 0 : i32
    return %c0_i32 : i32
  }
  func.func @transform_2(%arg0: i32) -> (i32, i32) {
    %c0_i32 = arith.constant 0 : i32
    %c0_i32_0 = arith.constant 0 : i32
    return %arg0, %c0_i32 : i32, i32
  }
  func.func @transform_3(%arg0: i32) -> (i32, i32) {
    %c0_i32 = arith.constant 0 : i32
    %c0_i32_0 = arith.constant 0 : i32
    return %arg0, %c0_i32 : i32, i32
  }
  func.func @transform_4(%arg0: i32) -> (i32, i32) {
    %c0_i32 = arith.constant 0 : i32
    %c0_i32_0 = arith.constant 0 : i32
    return %arg0, %c0_i32 : i32, i32
  }
}

</mosaic_0001>

<bundles_post_ra>
// kernel: tpu_custom_call.1
= control target key start
LH: loop header
LB: loop body
LE: loop exit
PB: predicated region body
PF: predicated region fallthrough
CT: control target
= control target key end

     0   :  { %11 = vsyncpa [#allocation5], 0  ;;  %s168_s0 = inlined_call_operand.<no memory space> [shape: f32[1], index: 0, kind: input, shape index: {}]   ;;  %s169_s1 = inlined_call_operand.<no memory space> [shape: f32[1], index: 1, kind: input, shape index: {}]   ;;  %s170_s2 = inlined_call_operand.hbm [shape: f32[8,128], index: 2, kind: input, shape index: {}]   ;;  %s171_s3 = inlined_call_operand.vmem [shape: f32[8,128], index: 3, kind: input, shape index: {}]   ;;  %s172_s4 = inlined_call_operand.hbm [shape: f32[8,128], index: 4, kind: output, shape index: {}]  }
   0x1   :  { %12 = vsyncpa [#allocation6], 0  ;;  %s108_s15 = smov [#allocation4]   ;;  %s60_s19 = scalar_lea.hbm %s170_s2, 128 }
   0x2   :  { %s23_s16 = sshll.u32 %s108_s15, 4  ;;  %p61_p0 = scmp.ne.s32.totalorder %s170_s2, %s60_s19  ;;  %s24_s16 = int_to_ptr.vmem [resolvable:$true] %s23_s16 }
   0x3   :  { %p64_p1 = scmp.lt.u32.totalorder %s60_s19, %s170_s2 }
   0x5   :  { %p66_p2 = pnand %p64_p1, %p61_p0 }
   0x7   :  { %69 = shalt.err (!%p66_p2)
}
   0x8   :  { %s70_s24 = scalar_lea.vmem %s24_s16, 128  ;;  %p75_p4 = scmp.lt.s32.totalorder %s24_s16, %s24_s16 }
   0x9   :  { %p71_p3 = scmp.ne.s32.totalorder %s24_s16, %s70_s24  ;;  %p76_p5 = scmp.lt.s32.totalorder %s70_s24, %s70_s24 }
   0xb   :  { %p77_p6 = por %p76_p5, %p75_p4 }
   0xd   :  { %p78_p7 = pnand %p77_p6, %p71_p3 }
   0xf   :  { %81 = shalt.err (!%p78_p7)
}
  0x10   :  { %26 = dma.hbm_to_vmem [thread:$0]  %s170_s2, 128, %s24_s16, [#allocation5]  }
  0x11   :  { %104 = dma.done.wait [#allocation5], 128  }
  0x12   :  { %105 = vsyncadd [#allocation5], 4294967168  ;;  %v36_v0 = vstv %s169_s1  ;;  %v38_v1 = vstv %s168_s0  ;;  %v34_v2 = vld [vmem:[#allocation4] sm:$0xff]  ;;  %s109_s7 = smov [#allocation7]  }
  0x13   :  { %v35_v3 = vld [vmem:[%s171_s3] sm:$0xff]  ;;  %s49_s8 = sshll.u32 %s109_s7, 4  ;;  %s50_s8 = int_to_ptr.vmem [resolvable:$true] %s49_s8 }
  0x14   :  { %v37_v4 = vmul.f32 %v36_v0, %v35_v3  ;;  %v39_v5 = vmul.f32 %v38_v1, %v35_v3  ;;  %s82_s2 = scalar_lea.vmem %s50_s8, 128  ;;  %p87_p9 = scmp.lt.s32.totalorder %s50_s8, %s50_s8 }
  0x15   :  { %p83_p8 = scmp.ne.s32.totalorder %s50_s8, %s82_s2  ;;  %p88_p10 = scmp.lt.s32.totalorder %s82_s2, %s82_s2 }
  0x16   :  { %v40_v6 = vmin.f32 %v39_v5, %v34_v2 }
  0x17   :  { %p89_p11 = por %p88_p10, %p87_p9 }
  0x18   :  { %v41_v7 = vmax.f32 %v37_v4, %v40_v6 }
  0x19   :  { %p90_p12 = pnand %p89_p11, %p83_p8 }
  0x1a   :  { %42 = vst [vmem:[#allocation7] sm:$0xff] %v41_v7 }
  0x1b   :  { %93 = shalt.err (!%p90_p12)
}
  0x1c   :  { %s94_s9 = scalar_lea.hbm %s172_s4, 128 }
  0x1d   :  { %p95_p13 = scmp.ne.s32.totalorder %s172_s4, %s94_s9  ;;  %p98_p0 = scmp.lt.u32.totalorder %s94_s9, %s172_s4 }
  0x1f   :  { %p100_p1 = pnand %p98_p0, %p95_p13 }
  0x21   :  { %103 = shalt.err (!%p100_p1)
}
  0x22   :  { %52 = dma.vmem_to_hbm [thread:$0]  %s50_s8, 128, %s172_s4, [#allocation6]  }
  0x23   :  { %106 = dma.done.wait [#allocation6], 128  }
  0x24   :  { %107 = vsyncadd [#allocation6], 4294967168 }
  0x25   :  { %56 = vsyncpa [#allocation5], 1 }
  0x26   :  { %57 = vsyncpa [#allocation6], 1 }

</bundles_post_ra>
